<compile_context>
chip_gen: v5e
topology: v5e:2x2
jax: 0.10.0
libtpu: 0.0.40
codegen_flags: <defaults>
</compile_context>

<pallas_src>
import functools

import jax
import jax.numpy as jnp
from jax import lax
from jax.experimental import pallas as pl
from jax.experimental.pallas import tpu as pltpu

BN_EPS = 1e-5
_VMEM_LIMIT = 40 * 1024 * 1024   # explicit scoped-VMEM limit (<= v7x's 64 MiB physical)
_MAX_TILE_HW = 4096              # lane-dim tile over Ho*Wo (multiple of 128)


# --------------------------------------------------------------------------------------
# Kernels
# --------------------------------------------------------------------------------------
def _stats_kernel(p_ref, w_ref, sum_ref, ssq_ref):
    """Pass 1: conv tile (Cout, TILE) + per-channel sum / sum-of-squares accumulation."""
    @pl.when(jnp.logical_and(pl.program_id(0) == 0, pl.program_id(1) == 0))
    def _():
        sum_ref[...] = jnp.zeros_like(sum_ref)
        ssq_ref[...] = jnp.zeros_like(ssq_ref)

    conv = jnp.dot(w_ref[...], p_ref[0],
                   preferred_element_type=jnp.float32)          # (Cout, TILE) f32
    sum_ref[...] += jnp.sum(conv, axis=-1, keepdims=True)        # lane reduce -> (Cout, 1)
    ssq_ref[...] += jnp.sum(conv * conv, axis=-1, keepdims=True)


def _conv_bn_relu_kernel(p_ref, w_ref, scale_ref, shift_ref, o_ref):
    """Pass 2: recompute conv tile, apply folded BN affine + ReLU (lane-dense store)."""
    conv = jnp.dot(w_ref[...], p_ref[0],
                   preferred_element_type=jnp.float32)          # (Cout, TILE) f32
    y = conv * scale_ref[...] + shift_ref[...]                   # folded BN: scale/shift (FMA)
    o_ref[0] = jnp.maximum(y, 0.0).astype(o_ref.dtype)


# --------------------------------------------------------------------------------------
# Wrapper
# --------------------------------------------------------------------------------------
def _choose_hw_tile(hw, max_tile=_MAX_TILE_HW):
    """Tile over Ho*Wo: either one full-dim tile, or a 128-aligned tile with zero-padding."""
    if hw <= max_tile:
        return hw, hw                       # full-dim block (exempt from the 128 rule)
    tile = max_tile                         # multiple of 128
    hw_pad = pl.cdiv(hw, tile) * tile       # zero-padded columns contribute 0 to the BN sums
    return tile, hw_pad


@functools.partial(jax.jit, static_argnames=("compute_dtype",))
def stem_forward(x_nchw, weight_oihw, gamma, beta, *, compute_dtype=jnp.bfloat16):
    """x_nchw: (N, 3, H, W); weight_oihw: (Cout, 3, 3, 3); gamma/beta: (Cout,) -> (N, Cout, Ho, Wo)."""
    N, Cin, H, W = x_nchw.shape
    Cout, _, KH, KW = weight_oihw.shape
    stride, pad = 2, 1
    Ho = (H + 2 * pad - KH) // stride + 1
    Wo = (W + 2 * pad - KW) // stride + 1
    HW = Ho * Wo
    K = KH * KW * Cin
    K_pad = ((K + 7) // 8) * 8              # 27 -> 32: sublane-aligned contraction dim

    tile_hw, HWp = _choose_hw_tile(HW)
    num_hw_tiles = HWp // tile_hw
    grid = (N, num_hw_tiles)

    # ---- glue: pad + im2col, built directly in the transposed (N, K_pad, Ho*Wo) layout ----
    # TODO(synk): build the 9 taps inside the kernel (polyphase split + VMEM slices) to avoid
    # materializing the patch matrix in HBM; kept as XLA glue here for lowering robustness.
    xf = x_nchw.astype(jnp.float32)
    xp = jnp.pad(xf, ((0, 0), (0, 0), (pad, pad), (pad, pad)))
    taps = [xp[:, :, kh:kh + stride * Ho:stride, kw:kw + stride * Wo:stride]
            for kh in range(KH) for kw in range(KW)]             # each (N, Cin, Ho, Wo)
    patches = jnp.stack(taps, axis=1).reshape(N, K, HW)          # K index = (kh*KW+kw)*Cin + ci
    patches = jnp.pad(patches, ((0, 0), (0, K_pad - K), (0, HWp - HW)))
    patches = patches.astype(compute_dtype)

    w_mat = weight_oihw.astype(jnp.float32).transpose(0, 2, 3, 1).reshape(Cout, K)
    w_mat = jnp.pad(w_mat, ((0, 0), (0, K_pad - K))).astype(compute_dtype)

    p_spec = pl.BlockSpec((1, K_pad, tile_hw), lambda n, t: (n, 0, t))
    w_spec = pl.BlockSpec((Cout, K_pad), lambda n, t: (0, 0))
    vec_spec = pl.BlockSpec((Cout, 1), lambda n, t: (0, 0))

    flops_mm = 2 * N * HWp * K_pad * Cout
    p_bytes = int(patches.size) * patches.dtype.itemsize
    w_bytes = int(w_mat.size) * w_mat.dtype.itemsize

    # ---- pass 1: per-channel batch statistics (resident accumulator over both grid axes) ----
    ch_sum, ch_ssq = pl.pallas_call(
        _stats_kernel,
        out_shape=(jax.ShapeDtypeStruct((Cout, 1), jnp.float32),
                   jax.ShapeDtypeStruct((Cout, 1), jnp.float32)),
        grid=grid,
        in_specs=[p_spec, w_spec],
        out_specs=(vec_spec, vec_spec),
        compiler_params=pltpu.CompilerParams(
            dimension_semantics=("arbitrary", "arbitrary"),
            vmem_limit_bytes=_VMEM_LIMIT),
        cost_estimate=pl.CostEstimate(
            flops=flops_mm, transcendentals=0,
            bytes_accessed=p_bytes + w_bytes + 2 * Cout * 4),
    )(patches, w_mat)

    # ---- fold BN into per-channel scale/shift (tiny (Cout,) math, f32) ----
    # TODO(synk): PyTorch BatchNorm2d (training) also updates running_mean/running_var buffers;
    # only the forward activation is produced here (mean/var are available below if needed).
    cnt = jnp.float32(N * HW)                    # zero-padded columns contributed 0 to the sums
    mean = ch_sum[:, 0] / cnt
    var = jnp.maximum(ch_ssq[:, 0] / cnt - mean * mean, 0.0)   # biased batch variance
    # TODO(synk): for very large N*Ho*Wo prefer per-tile mean/M2 (Welford) combine to avoid
    # E[x^2]-E[x]^2 cancellation; f32 accumulators are ample at these sizes.
    inv = lax.rsqrt(var + BN_EPS)
    g = gamma.astype(jnp.float32)
    b = beta.astype(jnp.float32)
    scale = (g * inv).reshape(Cout, 1)
    shift = (b - mean * g * inv).reshape(Cout, 1)

    # ---- pass 2: conv + folded BN + ReLU, written directly in (N, Cout, Ho*Wo) ----
    out = pl.pallas_call(
        _conv_bn_relu_kernel,
        out_shape=jax.ShapeDtypeStruct((N, Cout, HWp), jnp.float32),
        grid=grid,
        in_specs=[p_spec, w_spec,
                  pl.BlockSpec((Cout, 1), lambda n, t: (0, 0)),
                  pl.BlockSpec((Cout, 1), lambda n, t: (0, 0))],
        out_specs=pl.BlockSpec((1, Cout, tile_hw), lambda n, t: (n, 0, t)),
        compiler_params=pltpu.CompilerParams(
            dimension_semantics=("parallel", "parallel"),   # independent tiles: megacore on v7x
            vmem_limit_bytes=_VMEM_LIMIT),
        cost_estimate=pl.CostEstimate(
            flops=flops_mm + 2 * N * HWp * Cout, transcendentals=0,
            bytes_accessed=p_bytes + w_bytes + N * Cout * HWp * 4),
    )(patches, w_mat, scale, shift)

    # Already channel-major: just drop HW padding and unflatten spatial (free reshape, no transpose).
    return out[:, :, :HW].reshape(N, Cout, Ho, Wo)


# --------------------------------------------------------------------------------------
# Pure-JAX reference (lax conv + training-mode BN + ReLU)
# --------------------------------------------------------------------------------------
def _reference(x_nchw, weight_oihw, gamma, beta):
    y = lax.conv_general_dilated(
        x_nchw.astype(jnp.float32), weight_oihw.astype(jnp.float32),
        window_strides=(2, 2), padding=((1, 1), (1, 1)),
        dimension_numbers=("NCHW", "OIHW", "NCHW"))
    mean = jnp.mean(y, axis=(0, 2, 3), keepdims=True)
    var = jnp.mean((y - mean) ** 2, axis=(0, 2, 3), keepdims=True)
    yn = (y - mean) * lax.rsqrt(var + BN_EPS)
    yn = yn * gamma.reshape(1, -1, 1, 1) + beta.reshape(1, -1, 1, 1)
    return jnp.maximum(yn, 0.0)


if __name__ == "__main__":
    key = jax.random.PRNGKey(0)
    k_x, k_w = jax.random.split(key)

    N, Cin, H, W = 2, 3, 16, 16
    Cout = 32

    x = jax.random.normal(k_x, (N, Cin, H, W), dtype=jnp.float32)
    fan_in = Cin * 3 * 3
    weight = jax.random.normal(k_w, (Cout, Cin, 3, 3), dtype=jnp.float32) * (fan_in ** -0.5)
    gamma = 1.0 + 0.1 * jnp.linspace(-1.0, 1.0, Cout, dtype=jnp.float32)
    beta = 0.05 * jnp.linspace(-1.0, 1.0, Cout, dtype=jnp.float32)

    ref = jax.block_until_ready(_reference(x, weight, gamma, beta))

    # f32 operands: bit-accurate path (tight tolerance).
    out_f32 = jax.block_until_ready(
        stem_forward(x, weight, gamma, beta, compute_dtype=jnp.float32))
    assert out_f32.shape == (N, Cout, H // 2, W // 2), out_f32.shape
    assert jnp.allclose(out_f32, ref, atol=1e-4, rtol=1e-4), \
        float(jnp.max(jnp.abs(out_f32 - ref)))

    # bf16 matmul operands (default; halves HBM/VMEM bytes of the patch stream on v6e/v7x),
    # f32 accumulation + f32 BN math -> loose tolerance vs. the f32 reference.
    out_bf16 = jax.block_until_ready(
        stem_forward(x, weight, gamma, beta, compute_dtype=jnp.bfloat16))
    assert out_bf16.shape == (N, Cout, H // 2, W // 2), out_bf16.shape
    assert jnp.allclose(out_bf16, ref, atol=5e-2, rtol=5e-2), \
        float(jnp.max(jnp.abs(out_bf16 - ref)))

    print("KERNEL_OK")
</pallas_src>

<mosaic_0001>
module attributes {stable_mosaic.version = 11 : i64} {
  func.func @_stats_kernel(%arg0: i32, %arg1: i32, %arg2: memref<1x32x64xf32, #tpu.memory_space<vmem>>, %arg3: memref<32x32xf32, #tpu.memory_space<vmem>>, %arg4: memref<32x1xf32, #tpu.memory_space<vmem>>, %arg5: memref<32x1xf32, #tpu.memory_space<vmem>>) attributes {dimension_semantics = [#tpu.dimension_semantics<arbitrary>, #tpu.dimension_semantics<arbitrary>], iteration_bounds = array<i64: 2, 1>, scalar_prefetch = 0 : i64, scratch_operands = 0 : i64, tpu.core_type = #tpu.core_type<tc>, window_params = [{transform_indices = @transform_0, window_bounds = array<i64: 1, 32, 64>}, {pipeline_mode = #tpu.pipeline_mode<synchronous>, transform_indices = @transform_1, window_bounds = array<i64: 32, 32>}, {pipeline_mode = #tpu.pipeline_mode<synchronous>, transform_indices = @transform_2, window_bounds = array<i64: 32, 1>}, {pipeline_mode = #tpu.pipeline_mode<synchronous>, transform_indices = @transform_3, window_bounds = array<i64: 32, 1>}]} {
    %c0_i32 = arith.constant 0 : i32
    %0 = arith.cmpi eq, %arg0, %c0_i32 : i32
    %c0_i32_0 = arith.constant 0 : i32
    %1 = arith.cmpi eq, %arg1, %c0_i32_0 : i32
    %2 = arith.andi %0, %1 : i1
    %3 = arith.extui %2 : i1 to i32
    %c0_i32_1 = arith.constant 0 : i32
    %4 = arith.cmpi ne, %3, %c0_i32_1 : i32
    scf.if %4 {
      %cst_16 = arith.constant 0.000000e+00 : f32
      %20 = vector.broadcast %cst_16 : f32 to vector<32x1xf32>
      %c0_17 = arith.constant 0 : index
      %c0_18 = arith.constant 0 : index
      %21 = vector.load %arg4[%c0_17, %c0_18] : memref<32x1xf32, #tpu.memory_space<vmem>>, vector<32x1xf32>
      tpu.vector_store %arg4[%c0_17, %c0_18], %20 {strides = array<i32>} : memref<32x1xf32, #tpu.memory_space<vmem>>, vector<32x1xf32>,
      %cst_19 = arith.constant 0.000000e+00 : f32
      %22 = vector.broadcast %cst_19 : f32 to vector<32x1xf32>
      %c0_20 = arith.constant 0 : index
      %c0_21 = arith.constant 0 : index
      %23 = vector.load %arg5[%c0_20, %c0_21] : memref<32x1xf32, #tpu.memory_space<vmem>>, vector<32x1xf32>
      tpu.vector_store %arg5[%c0_20, %c0_21], %22 {strides = array<i32>} : memref<32x1xf32, #tpu.memory_space<vmem>>, vector<32x1xf32>,
    } else {
    }
    %c0 = arith.constant 0 : index
    %c0_2 = arith.constant 0 : index
    %5 = vector.load %arg3[%c0, %c0_2] : memref<32x32xf32, #tpu.memory_space<vmem>>, vector<32x32xf32>
    %c0_3 = arith.constant 0 : index
    %c0_4 = arith.constant 0 : index
    %c0_5 = arith.constant 0 : index
    %6 = vector.load %arg2[%c0_3, %c0_4, %c0_5] : memref<1x32x64xf32, #tpu.memory_space<vmem>>, vector<1x32x64xf32>
    %7 = vector.shape_cast %6 : vector<1x32x64xf32> to vector<32x64xf32>
    %cst = arith.constant dense<0.000000e+00> : vector<32x64xf32>
    %8 = tpu.matmul %5, %7, %cst {dimension_numbers = #tpu.dot_dimension_numbers<[1], [0], [0], [1], [0, 0, 1, 1], [], []>} : vector<32x32xf32>, vector<32x64xf32>, vector<32x64xf32> -> vector<32x64xf32>
    %c0_6 = arith.constant 0 : index
    %c0_7 = arith.constant 0 : index
    %9 = vector.load %arg4[%c0_6, %c0_7] : memref<32x1xf32, #tpu.memory_space<vmem>>, vector<32x1xf32>
    %cst_8 = arith.constant dense<0.000000e+00> : vector<32xf32>
    %10 = vector.multi_reduction <add>, %8, %cst_8 [1] : vector<32x64xf32> to vector<32xf32>
    %11 = vector.shape_cast %10 : vector<32xf32> to vector<32x1xf32>
    %12 = arith.addf %9, %11 : vector<32x1xf32>
    %c0_9 = arith.constant 0 : index
    %c0_10 = arith.constant 0 : index
    %13 = vector.load %arg4[%c0_9, %c0_10] : memref<32x1xf32, #tpu.memory_space<vmem>>, vector<32x1xf32>
    tpu.vector_store %arg4[%c0_9, %c0_10], %12 {strides = array<i32>} : memref<32x1xf32, #tpu.memory_space<vmem>>, vector<32x1xf32>,
    %c0_11 = arith.constant 0 : index
    %c0_12 = arith.constant 0 : index
    %14 = vector.load %arg5[%c0_11, %c0_12] : memref<32x1xf32, #tpu.memory_space<vmem>>, vector<32x1xf32>
    %15 = arith.mulf %8, %8 : vector<32x64xf32>
    %cst_13 = arith.constant dense<0.000000e+00> : vector<32xf32>
    %16 = vector.multi_reduction <add>, %15, %cst_13 [1] : vector<32x64xf32> to vector<32xf32>
    %17 = vector.shape_cast %16 : vector<32xf32> to vector<32x1xf32>
    %18 = arith.addf %14, %17 : vector<32x1xf32>
    %c0_14 = arith.constant 0 : index
    %c0_15 = arith.constant 0 : index
    %19 = vector.load %arg5[%c0_14, %c0_15] : memref<32x1xf32, #tpu.memory_space<vmem>>, vector<32x1xf32>
    tpu.vector_store %arg5[%c0_14, %c0_15], %18 {strides = array<i32>} : memref<32x1xf32, #tpu.memory_space<vmem>>, vector<32x1xf32>,
    return
  }
  func.func @transform_0(%arg0: i32, %arg1: i32) -> (i32, i32, i32) {
    %c0_i32 = arith.constant 0 : i32
    %c0_i32_0 = arith.constant 0 : i32
    return %arg0, %c0_i32, %arg1 : i32, i32, i32
  }
  func.func @transform_1(%arg0: i32, %arg1: i32) -> (i32, i32) {
    %c0_i32 = arith.constant 0 : i32
    %c0_i32_0 = arith.constant 0 : i32
    %c0_i32_1 = arith.constant 0 : i32
    return %c0_i32, %c0_i32_0 : i32, i32
  }
  func.func @transform_2(%arg0: i32, %arg1: i32) -> (i32, i32) {
    %c0_i32 = arith.constant 0 : i32
    %c0_i32_0 = arith.constant 0 : i32
    %c0_i32_1 = arith.constant 0 : i32
    return %c0_i32, %c0_i32_0 : i32, i32
  }
  func.func @transform_3(%arg0: i32, %arg1: i32) -> (i32, i32) {
    %c0_i32 = arith.constant 0 : i32
    %c0_i32_0 = arith.constant 0 : i32
    %c0_i32_1 = arith.constant 0 : i32
    return %c0_i32, %c0_i32_0 : i32, i32
  }
}

module attributes {stable_mosaic.version = 11 : i64} {
  func.func @_conv_bn_relu_kernel(%arg0: i32, %arg1: i32, %arg2: memref<1x32x64xf32, #tpu.memory_space<vmem>>, %arg3: memref<32x32xf32, #tpu.memory_space<vmem>>, %arg4: memref<32x1xf32, #tpu.memory_space<vmem>>, %arg5: memref<32x1xf32, #tpu.memory_space<vmem>>, %arg6: memref<1x32x64xf32, #tpu.memory_space<vmem>>) attributes {dimension_semantics = [#tpu.dimension_semantics<parallel>, #tpu.dimension_semantics<parallel>], iteration_bounds = array<i64: 2, 1>, scalar_prefetch = 0 : i64, scratch_operands = 0 : i64, tpu.core_type = #tpu.core_type<tc>, window_params = [{transform_indices = @transform_0, window_bounds = array<i64: 1, 32, 64>}, {pipeline_mode = #tpu.pipeline_mode<synchronous>, transform_indices = @transform_1, window_bounds = array<i64: 32, 32>}, {pipeline_mode = #tpu.pipeline_mode<synchronous>, transform_indices = @transform_2, window_bounds = array<i64: 32, 1>}, {pipeline_mode = #tpu.pipeline_mode<synchronous>, transform_indices = @transform_3, window_bounds = array<i64: 32, 1>}, {transform_indices = @transform_4, window_bounds = array<i64: 1, 32, 64>}]} {
    %c0 = arith.constant 0 : index
    %c0_0 = arith.constant 0 : index
    %0 = vector.load %arg3[%c0, %c0_0] : memref<32x32xf32, #tpu.memory_space<vmem>>, vector<32x32xf32>
    %c0_1 = arith.constant 0 : index
    %c0_2 = arith.constant 0 : index
    %c0_3 = arith.constant 0 : index
    %1 = vector.load %arg2[%c0_1, %c0_2, %c0_3] : memref<1x32x64xf32, #tpu.memory_space<vmem>>, vector<1x32x64xf32>
    %2 = vector.shape_cast %1 : vector<1x32x64xf32> to vector<32x64xf32>
    %cst = arith.constant dense<0.000000e+00> : vector<32x64xf32>
    %3 = tpu.matmul %0, %2, %cst {dimension_numbers = #tpu.dot_dimension_numbers<[1], [0], [0], [1], [0, 0, 1, 1], [], []>} : vector<32x32xf32>, vector<32x64xf32>, vector<32x64xf32> -> vector<32x64xf32>
    %c0_4 = arith.constant 0 : index
    %c0_5 = arith.constant 0 : index
    %4 = vector.load %arg4[%c0_4, %c0_5] : memref<32x1xf32, #tpu.memory_space<vmem>>, vector<32x1xf32>
    %5 = vector.broadcast %4 : vector<32x1xf32> to vector<32x64xf32>
    %6 = arith.mulf %3, %5 : vector<32x64xf32>
    %c0_6 = arith.constant 0 : index
    %c0_7 = arith.constant 0 : index
    %7 = vector.load %arg5[%c0_6, %c0_7] : memref<32x1xf32, #tpu.memory_space<vmem>>, vector<32x1xf32>
    %8 = vector.broadcast %7 : vector<32x1xf32> to vector<32x64xf32>
    %9 = arith.addf %6, %8 : vector<32x64xf32>
    %cst_8 = arith.constant 0.000000e+00 : f32
    %10 = vector.broadcast %cst_8 : f32 to vector<32x64xf32>
    %11 = arith.maximumf %9, %10 : vector<32x64xf32>
    %c0_9 = arith.constant 0 : index
    %c0_10 = arith.constant 0 : index
    %c0_11 = arith.constant 0 : index
    %12 = vector.load %arg6[%c0_9, %c0_10, %c0_11] : memref<1x32x64xf32, #tpu.memory_space<vmem>>, vector<1x32x64xf32>
    %13 = vector.shape_cast %12 : vector<1x32x64xf32> to vector<32x64xf32>
    %14 = vector.shape_cast %11 : vector<32x64xf32> to vector<1x32x64xf32>
    tpu.vector_store %arg6[%c0_9, %c0_10, %c0_11], %14 {strides = array<i32>} : memref<1x32x64xf32, #tpu.memory_space<vmem>>, vector<1x32x64xf32>,
    return
  }
  func.func @transform_0(%arg0: i32, %arg1: i32) -> (i32, i32, i32) {
    %c0_i32 = arith.constant 0 : i32
    %c0_i32_0 = arith.constant 0 : i32
    return %arg0, %c0_i32, %arg1 : i32, i32, i32
  }
  func.func @transform_1(%arg0: i32, %arg1: i32) -> (i32, i32) {
    %c0_i32 = arith.constant 0 : i32
    %c0_i32_0 = arith.constant 0 : i32
    %c0_i32_1 = arith.constant 0 : i32
    return %c0_i32, %c0_i32_0 : i32, i32
  }
  func.func @transform_2(%arg0: i32, %arg1: i32) -> (i32, i32) {
    %c0_i32 = arith.constant 0 : i32
    %c0_i32_0 = arith.constant 0 : i32
    %c0_i32_1 = arith.constant 0 : i32
    return %c0_i32, %c0_i32_0 : i32, i32
  }
  func.func @transform_3(%arg0: i32, %arg1: i32) -> (i32, i32) {
    %c0_i32 = arith.constant 0 : i32
    %c0_i32_0 = arith.constant 0 : i32
    %c0_i32_1 = arith.constant 0 : i32
    return %c0_i32, %c0_i32_0 : i32, i32
  }
  func.func @transform_4(%arg0: i32, %arg1: i32) -> (i32, i32, i32) {
    %c0_i32 = arith.constant 0 : i32
    %c0_i32_0 = arith.constant 0 : i32
    return %arg0, %c0_i32, %arg1 : i32, i32, i32
  }
}

</mosaic_0001>

<bundles_post_ra>
// kernel: stem_forward.2
= control target key start
LH: loop header
LB: loop body
LE: loop exit
PB: predicated region body
PF: predicated region fallthrough
CT: control target
= control target key end

     0   :  { %s441_s12 = smov 0   ;;  %s443_s13 = smov 0   ;;  %s571_s0 = inlined_call_operand.vmem [shape: f32[2,32,64], index: 0, kind: input, shape index: {}]   ;;  %s572_s1 = inlined_call_operand.vmem [shape: f32[32,32], index: 1, kind: input, shape index: {}]   ;;  %s573_s2 = inlined_call_operand.vmem [shape: f32[32,1], index: 2, kind: output, shape index: {0}]   ;;  %s574_s3 = inlined_call_operand.vmem [shape: f32[32,1], index: 3, kind: output, shape index: {1}]  }
   0x1   :  { %s445_s14 = smov 0  }
   0x2 LB: > { %s26_s15 = sadd.s32 1, %s414_s13  ;;  %p347_p0 = scmp.ge.s32.totalorder %s418_s14, 1  ;;  %s418_s14 = sphi %s445_s14, %s14_s14   ;;  %s414_s13 = sphi %s443_s13, %s576_s13   ;;  %s410_s12 = sphi %s441_s12, %s575_s12  }
   0x3   : > { %p28_p1 = scmp.ge.s32.totalorder %s26_s15, 2  ;;  %p147_p2 = scmp.lt.s32.totalorder %s418_s14, 3 }
   0x5   : > { %s578_s15 = smov (%p28_p1, %s26_s15), 0  ;;  %p148_p3 = pnand %p347_p0, %p147_p2 }
   0x6   : > { %p169_p4 = scmp.lt.s32.totalorder (!%p148_p3), %s410_s12, 1  ;;  %p177_p5 = scmp.eq.s32.totalorder (!%p148_p3), %s410_s12, 0 }
   0x7   : > { %151 = sbr.rel (%p148_p3) target bundleno = 297 (0x129), region = 28 }
   0xc   : > { %s580_s12 = smov (!%p169_p4, %s410_s12), 1  ;;  %182 = sbr.rel (!%p177_p5) target bundleno = 21 (0x15), region = 32  ;;  %vm183_vm0 = vcmask (%p177_p5), 7168   ;;  %v420_v0 = vmov (%p177_p5), 0.0  }
   0xd   : > { %s357_s16 = sshll.u32 %s580_s12, 5  ;;  %184 = vst.msk [vmem:[%s573_s2] sm:$0xff] (%p177_p5), %vm183_vm0, %v420_v0 }
   0xe   : > { %s176_s19 = scalar_lea.vmem %s571_s0, %s357_s16  ;;  %185 = vst.msk [vmem:[%s573_s2 + $0x8] sm:$0xff] (%p177_p5), %vm183_vm0, %v420_v0 }
   0xf   : > { %186 = vst.msk [vmem:[%s573_s2 + $0x10] sm:$0xff] (%p177_p5), %vm183_vm0, %v420_v0 }
  0x10   : > { %187 = vst.msk [vmem:[%s573_s2 + $0x18] sm:$0xff] (%p177_p5), %vm183_vm0, %v420_v0 }
  0x11   : > { %188 = vst.msk [vmem:[%s574_s3] sm:$0xff] %vm183_vm0, %v420_v0 }
  0x12   : > { %189 = vst.msk [vmem:[%s574_s3 + $0x8] sm:$0xff] %vm183_vm0, %v420_v0 }
  0x13   : > { %190 = vst.msk [vmem:[%s574_s3 + $0x10] sm:$0xff] %vm183_vm0, %v420_v0 }
  0x14   : > { %191 = vst.msk [vmem:[%s574_s3 + $0x18] sm:$0xff] %vm183_vm0, %v420_v0 }
  0x15 PF: > { %v199_v1 = vld [vmem:[%s176_s19 + $0x18] sm:$0xff]  ;;  %v198_v2 = vld [vmem:[%s176_s19 + $0x10] sm:$0xff]  ;;  %v197_v3 = vld [vmem:[%s176_s19 + $0x8] sm:$0xff]  ;;  %vm200_vm1 = vcmask 261120   ;;  %vm246_vm2 = vcmask 523264   ;;  %vm263_vm3 = vcmask 7168  }
  0x16   : > { %225 = vmatpush.msra.mxu0 %v199_v1  ;;  %360 = vmatpush.msra.mxu2 %v199_v1  ;;  %v196_v4 = vld [vmem:[%s176_s19] sm:$0xff]  ;;  %v194_v6 = vld [vmem:[%s572_s1 + $0x10] sm:$0xff]  ;;  %v193_v7 = vld [vmem:[%s572_s1 + $0x8] sm:$0xff] }
  0x17   : > { %359 = vmatpush.msra.mxu1 %v199_v1  ;;  %361 = vmatpush.msra.mxu3 %v199_v1  ;;  %v192_v5 = vld [vmem:[%s572_s1] sm:$0xff]  ;;  %v195_v8 = vld [vmem:[%s572_s1 + $0x18] sm:$0xff] }
  0x18   : > { %226 = vmatpush.msra.mxu0 %v198_v2  ;;  %363 = vmatpush.msra.mxu2 %v198_v2  ;;  %v242_v25 = vld [vmem:[%s573_s2] sm:$0xff] }
  0x19   : > { %362 = vmatpush.msra.mxu1 %v198_v2  ;;  %364 = vmatpush.msra.mxu3 %v198_v2  ;;  %v243_v33 = vld [vmem:[%s573_s2 + $0x8] sm:$0xff] }
  0x1a   : > { %227 = vmatpush.msra.mxu0 %v197_v3  ;;  %366 = vmatpush.msra.mxu2 %v197_v3  ;;  %v244_v31 = vld [vmem:[%s573_s2 + $0x10] sm:$0xff]  ;;  %v269_v36 = vld [vmem:[%s574_s3 + $0x8] sm:$0xff] }
  0x1b   : > { %365 = vmatpush.msra.mxu1 %v197_v3  ;;  %367 = vmatpush.msra.mxu3 %v197_v3  ;;  %v245_v40 = vld [vmem:[%s573_s2 + $0x18] sm:$0xff]  ;;  %v270_v42 = vld [vmem:[%s574_s3 + $0x10] sm:$0xff] }
  0x1c   : > { %228 = vmatpush.msra.mxu0 %v196_v4  ;;  %369 = vmatpush.msra.mxu2 %v196_v4  ;;  %v268_v27 = vld [vmem:[%s574_s3] sm:$0xff]  ;;  %v271_v46 = vld [vmem:[%s574_s3 + $0x18] sm:$0xff] }
  0x1d   : > { %351 = vmatmul.msk.f32.vlgmr.msra.gmra.mxu0 %vm200_vm1, %v192_v5  ;;  %353 = vmatmul.msk.f32.vlgmr.msra.gmra.mxu2 %vm200_vm1, %v194_v6 }
  0x1e   : > { %368 = vmatpush.msra.mxu1 %v196_v4  ;;  %370 = vmatpush.msra.mxu3 %v196_v4 }
  0x1f   : > { %352 = vmatmul.msk.f32.vlgmr.msra.gmra.mxu1 %vm200_vm1, %v193_v7  ;;  %354 = vmatmul.msk.f32.vlgmr.msra.gmra.mxu3 %vm200_vm1, %v195_v8 }
  0x9a   : > { %v230_v9 = vpop.f32.mrf.mxu0 }
  0x9b   : > { %v272_v10 = vmul.f32 %v230_v9, %v230_v9  ;;  %v247_v11 = vsel %vm246_vm2, %v230_v9, 0.0 }
  0x9c   : > { %248 = vadd.xlane.f32.xlu0 %v247_v11  ;;  %v233_v13 = vpop.f32.mrf.mxu1 }
  0x9d   : > { %v276_v12 = vsel %vm246_vm2, %v272_v10, 0.0  ;;  %v273_v14 = vmul.f32 %v233_v13, %v233_v13  ;;  %v250_v17 = vsel %vm246_vm2, %v233_v13, 0.0 }
  0x9e   : > { %277 = vadd.xlane.f32.xlu2 %v276_v12 }
  0x9f   : > { %v279_v18 = vsel %vm246_vm2, %v273_v14, 0.0 }
  0xa0   : > { %v236_v15 = vpop.f32.mrf.mxu2 }
  0xa1   : > { %v253_v16 = vsel %vm246_vm2, %v236_v15, 0.0  ;;  %v274_v20 = vmul.f32 %v236_v15, %v236_v15 }
  0xa2   : > { %254 = vadd.xlane.f32.xlu1 %v253_v16  ;;  %v239_v19 = vpop.f32.mrf.mxu3 }
  0xa3   : > { %v256_v21 = vsel %vm246_vm2, %v239_v19, 0.0  ;;  %v282_v22 = vsel %vm246_vm2, %v274_v20, 0.0  ;;  %v275_v23 = vmul.f32 %v239_v19, %v239_v19 }
  0xa4   : > { %251 = vadd.xlane.f32.xlu0 %v250_v17 }
  0xa5   : > { %v285_v24 = vsel %vm246_vm2, %v275_v23, 0.0 }
  0xa6   : > { %280 = vadd.xlane.f32.xlu2 %v279_v18 }
  0xaa   : > { %257 = vadd.xlane.f32.xlu1 %v256_v21 }
  0xac   : > { %283 = vadd.xlane.f32.xlu0 %v282_v22 }
  0xb2   : > { %286 = vadd.xlane.f32.xlu1 %v285_v24 }
 0x10f   : > { %v249_v26 = vpop.xlane.xlu0 %248 }
 0x110   : > { %v259_v28 = vadd.f32 %v249_v26, %v242_v25 }
 0x111   : > { %v278_v29 = vpop.xlane.xlu2 %277 }
 0x112   : > { %264 = vst.msk [vmem:[%s573_s2] sm:$0xff] %vm263_vm3, %v259_v28  ;;  %v288_v30 = vadd.f32 %v278_v29, %v268_v27 }
 0x114   : > { %292 = vst.msk [vmem:[%s574_s3] sm:$0xff] %vm263_vm3, %v288_v30 }
 0x115   : > { %v255_v32 = vpop.xlane.xlu1 %254 }
 0x116   : > { %v261_v34 = vadd.f32 %v255_v32, %v244_v31 }
 0x117   : > { %v252_v35 = vpop.xlane.xlu0 %251 }
 0x118   : > { %266 = vst.msk [vmem:[%s573_s2 + $0x10] sm:$0xff] %vm263_vm3, %v261_v34  ;;  %v260_v37 = vadd.f32 %v252_v35, %v243_v33 }
 0x119   : > { %v281_v38 = vpop.xlane.xlu2 %280 }
 0x11a   : > { %265 = vst.msk [vmem:[%s573_s2 + $0x8] sm:$0xff] %vm263_vm3, %v260_v37  ;;  %v289_v39 = vadd.f32 %v281_v38, %v269_v36 }
 0x11c   : > { %293 = vst.msk [vmem:[%s574_s3 + $0x8] sm:$0xff] %vm263_vm3, %v289_v39 }
 0x11d   : > { %v258_v41 = vpop.xlane.xlu1 %257 }
 0x11e   : > { %v262_v43 = vadd.f32 %v258_v41, %v245_v40 }
 0x11f   : > { %v284_v44 = vpop.xlane.xlu0 %283 }
 0x120   : > { %267 = vst.msk [vmem:[%s573_s2 + $0x18] sm:$0xff] %vm263_vm3, %v262_v43  ;;  %v290_v45 = vadd.f32 %v284_v44, %v270_v42 }
 0x122   : > { %294 = vst.msk [vmem:[%s574_s3 + $0x10] sm:$0xff] %vm263_vm3, %v290_v45 }
 0x125   : > { %v287_v47 = vpop.xlane.xlu1 %286 }
 0x126   : > { %v291_v48 = vadd.f32 %v287_v47, %v271_v46 }
 0x128   : > { %295 = vst.msk [vmem:[%s574_s3 + $0x18] sm:$0xff] %vm263_vm3, %v291_v48 }
 0x129 PF: > { %s14_s14 = sadd.s32 1, %s418_s14   ;;  %s575_s12 = smov %s414_s13 }
 0x12a   : > { %p11_p6 = scmp.ge.s32.totalorder %s14_s14, 4   ;;  %s576_s13 = smov %s578_s15 }
 0x12c   :  { %13 = sbr.rel (!%p11_p6) target bundleno = 2 (0x2), region = 66 }

// kernel: stem_forward.3
= control target key start
LH: loop header
LB: loop body
LE: loop exit
PB: predicated region body
PF: predicated region fallthrough
CT: control target
= control target key end

     0   :  { %s534_s15 = smov 0   ;;  %s536_s16 = smov 0   ;;  %s614_s0 = inlined_call_operand.vmem [shape: f32[2,32,64], index: 0, kind: input, shape index: {}]   ;;  %s615_s1 = inlined_call_operand.vmem [shape: f32[32,32], index: 1, kind: input, shape index: {}]   ;;  %s616_s2 = inlined_call_operand.vmem [shape: f32[32,1], index: 2, kind: input, shape index: {}]   ;;  %s617_s3 = inlined_call_operand.vmem [shape: f32[32,1], index: 3, kind: input, shape index: {}]   ;;  %s618_s4 = inlined_call_operand.vmem [shape: f32[2,32,64], index: 4, kind: output, shape index: {}]  }
   0x1   :  { %s538_s17 = smov 0  }
   0x2 LB: > { %s26_s18 = sadd.s32 1, %s502_s16  ;;  %p431_p0 = scmp.ge.s32.totalorder %s506_s17, 1  ;;  %s506_s17 = sphi %s538_s17, %s14_s17   ;;  %s502_s16 = sphi %s536_s16, %s620_s16   ;;  %s498_s15 = sphi %s534_s15, %s619_s15  }
   0x3   : > { %p28_p1 = scmp.ge.s32.totalorder %s26_s18, 2  ;;  %p181_p2 = scmp.lt.s32.totalorder %s506_s17, 3 }
   0x5   : > { %s622_s18 = smov (%p28_p1, %s26_s18), 0  ;;  %p182_p3 = pnand %p431_p0, %p181_p2 }
   0x6   : > { %p213_p4 = scmp.lt.s32.totalorder (!%p182_p3), %s498_s15, 1 }
   0x7   : > { %185 = sbr.rel (%p182_p3) target bundleno = 166 (0xa6), region = 36 }
   0xc   : > { %v281_v0 = vld [vmem:[%s616_s2 + $0x10] sm:$0xff]  ;;  %v279_v1 = vld [vmem:[%s616_s2] sm:$0xff]  ;;  %v508_v2 = vmov 0   ;;  %s624_s15 = smov (!%p213_p4, %s498_s15), 1  ;;  %v282_v6 = vld [vmem:[%s616_s2 + $0x18] sm:$0xff]  ;;  %vm237_vm0 = vcmask 261120  }
   0xd   : > { %482 = vset.pattern.permute.xlu1 %v508_v2  ;;  %481 = vset.pattern.permute.xlu0 %v508_v2  ;;  %v307_v3 = vld [vmem:[%s617_s3] sm:$0xff]  ;;  %s442_s25 = sshll.u32 %s624_s15, 5  ;;  %v280_v7 = vld [vmem:[%s616_s2 + $0x8] sm:$0xff]  ;;  %v231_v12 = vld [vmem:[%s615_s1 + $0x10] sm:$0xff]  ;;  %vm339_vm1 = vcmask 523264  }
   0xe   : > { %295 = vperm.xlu1 %482, %v281_v0   ;;  %285 = vperm.xlu0 %481, %v279_v1   ;;  %s220_s28 = scalar_lea.vmem %s614_s0, %s442_s25  ;;  %v229_v10 = vld [vmem:[%s615_s1] sm:$0xff]  ;;  %v230_v11 = vld [vmem:[%s615_s1 + $0x8] sm:$0xff]  ;;  %v232_v13 = vld [vmem:[%s615_s1 + $0x18] sm:$0xff] }
   0xf   : > { %483 = vset.pattern.permute.xlu2 %v508_v2  ;;  %v236_v4 = vld [vmem:[%s220_s28 + $0x18] sm:$0xff]  ;;  %v235_v5 = vld [vmem:[%s220_s28 + $0x10] sm:$0xff]  ;;  %v234_v8 = vld [vmem:[%s220_s28 + $0x8] sm:$0xff] }
  0x10   : > { %313 = vperm.xlu2 %483, %v307_v3   ;;  %262 = vmatpush.msra.mxu0 %v236_v4  ;;  %v233_v9 = vld [vmem:[%s220_s28] sm:$0xff]  ;;  %v308_v14 = vld [vmem:[%s617_s3 + $0x8] sm:$0xff]  ;;  %v310_v15 = vld [vmem:[%s617_s3 + $0x18] sm:$0xff]  ;;  %s228_s28 = scalar_lea.vmem %s618_s4, %s442_s25 }
  0x11   : > { %444 = vmatpush.msra.mxu1 %v236_v4  ;;  %445 = vmatpush.msra.mxu2 %v236_v4  ;;  %v309_v16 = vld [vmem:[%s617_s3 + $0x10] sm:$0xff] }
  0x12   : > { %446 = vmatpush.msra.mxu3 %v236_v4  ;;  %263 = vmatpush.msra.mxu0 %v235_v5 }
  0x13   : > { %447 = vmatpush.msra.mxu1 %v235_v5  ;;  %448 = vmatpush.msra.mxu2 %v235_v5 }
  0x14   : > { %449 = vmatpush.msra.mxu3 %v235_v5  ;;  %264 = vmatpush.msra.mxu0 %v234_v8 }
  0x15   : > { %450 = vmatpush.msra.mxu1 %v234_v8  ;;  %451 = vmatpush.msra.mxu2 %v234_v8 }
  0x16   : > { %300 = vperm.xlu1 %482, %v282_v6   ;;  %290 = vperm.xlu0 %481, %v280_v7  }
  0x17   : > { %452 = vmatpush.msra.mxu3 %v234_v8  ;;  %265 = vmatpush.msra.mxu0 %v233_v9 }
  0x18   : > { %453 = vmatpush.msra.mxu1 %v233_v9  ;;  %454 = vmatpush.msra.mxu2 %v233_v9 }
  0x19   : > { %455 = vmatpush.msra.mxu3 %v233_v9  ;;  %436 = vmatmul.msk.f32.vlgmr.msra.gmra.mxu0 %vm237_vm0, %v229_v10 }
  0x1a   : > { %437 = vmatmul.msk.f32.vlgmr.msra.gmra.mxu1 %vm237_vm0, %v230_v11  ;;  %438 = vmatmul.msk.f32.vlgmr.msra.gmra.mxu2 %vm237_vm0, %v231_v12 }
  0x1b   : > { %439 = vmatmul.msk.f32.vlgmr.msra.gmra.mxu3 %vm237_vm0, %v232_v13  ;;  %318 = vperm.xlu2 %483, %v308_v14  }
  0x1e   : > { %328 = vperm.xlu1 %482, %v310_v15   ;;  %323 = vperm.xlu0 %481, %v309_v16  }
  0x6a   : > { %v314_v19 = vpop.permute.xlu2 %313 }
  0x75   : > { %v319_v26 = vpop.permute.xlu2 %318 }
  0x80   : > { %v296_v17 = vpop.permute.xlu1 %295  ;;  %v286_v18 = vpop.permute.xlu0 %285 }
  0x88   : > { %v301_v20 = vpop.permute.xlu1 %300  ;;  %v291_v21 = vpop.permute.xlu0 %290 }
  0x90   : > { %v329_v35 = vpop.permute.xlu1 %328  ;;  %v324_v36 = vpop.permute.xlu0 %323 }
  0x96   : > { %v267_v22 = vpop.f32.mrf.mxu0 }
  0x97   : > { %v270_v23 = vpop.f32.mrf.mxu1  ;;  %v303_v24 = vmul.f32 %v286_v18, %v267_v22 }
  0x98   : > { %v304_v25 = vmul.f32 %v291_v21, %v270_v23 }
  0x99   : > { %v331_v27 = vadd.f32 %v314_v19, %v303_v24 }
  0x9a   : > { %v332_v28 = vadd.f32 %v319_v26, %v304_v25 }
  0x9b   : > { %v335_v29 = vmax.f32 %v331_v27, 0.0 }
  0x9c   : > { %v336_v30 = vmax.f32 %v332_v28, 0.0 }
  0x9d   : > { %340 = vst.msk [vmem:[%s228_s28] sm:$0xff] %vm339_vm1, %v335_v29  ;;  %v273_v31 = vpop.f32.mrf.mxu2 }
  0x9e   : > { %v276_v32 = vpop.f32.mrf.mxu3  ;;  %341 = vst.msk [vmem:[%s228_s28 + $0x8] sm:$0xff] %vm339_vm1, %v336_v30  ;;  %v305_v33 = vmul.f32 %v296_v17, %v273_v31 }
  0x9f   : > { %v306_v34 = vmul.f32 %v301_v20, %v276_v32 }
  0xa0   : > { %v333_v37 = vadd.f32 %v324_v36, %v305_v33 }
  0xa1   : > { %v334_v38 = vadd.f32 %v329_v35, %v306_v34 }
  0xa2   : > { %v337_v39 = vmax.f32 %v333_v37, 0.0 }
  0xa3   : > { %v338_v40 = vmax.f32 %v334_v38, 0.0 }
  0xa4   : > { %342 = vst.msk [vmem:[%s228_s28 + $0x10] sm:$0xff] %vm339_vm1, %v337_v39 }
  0xa5   : > { %343 = vst.msk [vmem:[%s228_s28 + $0x18] sm:$0xff] %vm339_vm1, %v338_v40 }
  0xa6 PF: > { %s14_s17 = sadd.s32 1, %s506_s17   ;;  %s619_s15 = smov %s502_s16 }
  0xa7   : > { %p11_p5 = scmp.ge.s32.totalorder %s14_s17, 4   ;;  %s620_s16 = smov %s622_s18 }
  0xa9   :  { %13 = sbr.rel (!%p11_p5) target bundleno = 2 (0x2), region = 66 }

</bundles_post_ra>
